<compile_context>
chip_gen: v7x
topology: tpu7x:2x2x1
jax: 0.10.0
libtpu: 0.0.40
codegen_flags: <defaults>
</compile_context>

<pallas_src>
import jax
import jax.numpy as jnp
from jax.experimental import pallas as pl
from jax.experimental.pallas import tpu as pltpu

_MAX_TILE_B = 2048  # large contiguous DMAs approach HBM roofline; VMEM is never the limit here


def _cdiv(a, b):
    return -(-a // b)


def _round_up(v, m):
    return _cdiv(v, m) * m


def _feat_embedding_kernel(x_ref, w_ref, o_ref):
    # One batch tile: [tile_b, 40] @ [40, 40] on the MXU, f32 accumulation.
    o_ref[...] = jnp.dot(
        x_ref[...], w_ref[...], preferred_element_type=jnp.float32
    ).astype(o_ref.dtype)


def feat_embedding_forward(x, w, *, tile_b=None):
    """y = x @ w  (w stored [in_features, out_features], no bias).

    x: [..., d_in] float32
    w: [d_in, d_out] float32
    Returns [..., d_out] float32.
    """
    orig_shape = x.shape
    d_in = orig_shape[-1]
    d_out = w.shape[1]
    assert w.shape[0] == d_in

    x2 = x.reshape(-1, d_in)
    B = x2.shape[0]

    if tile_b is None:
        if B <= _MAX_TILE_B:
            # Single grid step: block second-to-last dim == full batch dim,
            # so the (8,128) rule is satisfied without any padding, and
            # single-TC chips (v5e/v6e) pay zero per-step overhead.
            tile_b = B
        else:
            # Large batch: a few big tiles; even step count keeps v7x's two
            # TensorCores balanced on the "parallel" axis.
            n_steps = _cdiv(B, _MAX_TILE_B)
            if n_steps % 2:
                n_steps += 1
            tile_b = _round_up(_cdiv(B, n_steps), 8)
    else:
        assert tile_b == B or tile_b % 8 == 0, (
            "tile_b must be a multiple of 8 or equal the flattened batch"
        )

    grid = (_cdiv(B, tile_b),)

    # Advisory cost from TRUE sizes (not padded ones).
    cost = pl.CostEstimate(
        flops=2 * B * d_in * d_out,
        transcendentals=0,
        bytes_accessed=(B * (d_in + d_out) + d_in * d_out) * 4,
    )

    out = pl.pallas_call(
        _feat_embedding_kernel,
        out_shape=jax.ShapeDtypeStruct((B, d_out), jnp.float32),
        grid_spec=pltpu.PrefetchScalarGridSpec(
            num_scalar_prefetch=0,
            grid=grid,
            in_specs=[
                # x: tiled over the batch, full 40-wide feature dim (no pad).
                pl.BlockSpec((tile_b, d_in), lambda i: (i, 0)),
                # weight: resident across all grid steps (constant index_map).
                pl.BlockSpec((d_in, d_out), lambda i: (0, 0)),
            ],
            out_specs=pl.BlockSpec((tile_b, d_out), lambda i: (i, 0)),
        ),
        compiler_params=pltpu.CompilerParams(
            dimension_semantics=("parallel",),
        ),
        cost_estimate=cost,
    )(x2, w)

    return out.reshape(orig_shape[:-1] + (d_out,))


def init_params(key, d_in=40, d_out=40):
    """Mirror nn.Linear(40, 40, bias=False) init: U(-1/sqrt(fan_in), +1/sqrt(fan_in)).

    Weight is stored [in_features, out_features] (transpose of PyTorch layout),
    so forward is a plain x @ w.
    """
    bound = 1.0 / (d_in ** 0.5)
    return jax.random.uniform(
        key, (d_in, d_out), jnp.float32, minval=-bound, maxval=bound
    )


def _reference(x, w):
    return x @ w


if __name__ == "__main__":
    d_in = d_out = 40
    batch, seq = 2, 8

    key = jax.random.PRNGKey(0)
    key, kx, kw = jax.random.split(key, 3)
    x = jax.random.normal(kx, (batch, seq, d_in), jnp.float32)
    w = init_params(kw, d_in, d_out)

    out = feat_embedding_forward(x, w)
    out = jax.block_until_ready(out)

    ref = _reference(x, w)
    assert out.shape == (batch, seq, d_out)
    assert jnp.allclose(out, ref, atol=1e-4, rtol=1e-4)
    print("KERNEL_OK")
</pallas_src>

<mosaic_0001>
module attributes {stable_mosaic.version = 11 : i64} {
  func.func @_feat_embedding_kernel(%arg0: i32, %arg1: memref<16x40xf32, #tpu.memory_space<vmem>>, %arg2: memref<40x40xf32, #tpu.memory_space<vmem>>, %arg3: memref<16x40xf32, #tpu.memory_space<vmem>>) attributes {dimension_semantics = [#tpu.dimension_semantics<parallel>], iteration_bounds = array<i64: 1>, scalar_prefetch = 0 : i64, scratch_operands = 0 : i64, tpu.core_type = #tpu.core_type<tc>, window_params = [{transform_indices = @transform_0, window_bounds = array<i64: 16, 40>}, {pipeline_mode = #tpu.pipeline_mode<synchronous>, transform_indices = @transform_1, window_bounds = array<i64: 40, 40>}, {transform_indices = @transform_2, window_bounds = array<i64: 16, 40>}]} {
    %c0 = arith.constant 0 : index
    %c0_0 = arith.constant 0 : index
    %0 = vector.load %arg1[%c0, %c0_0] : memref<16x40xf32, #tpu.memory_space<vmem>>, vector<16x40xf32>
    %c0_1 = arith.constant 0 : index
    %c0_2 = arith.constant 0 : index
    %1 = vector.load %arg2[%c0_1, %c0_2] : memref<40x40xf32, #tpu.memory_space<vmem>>, vector<40x40xf32>
    %cst = arith.constant dense<0.000000e+00> : vector<16x40xf32>
    %2 = tpu.matmul %0, %1, %cst {dimension_numbers = #tpu.dot_dimension_numbers<[1], [0], [0], [1], [0, 0, 1, 1], [], []>} : vector<16x40xf32>, vector<40x40xf32>, vector<16x40xf32> -> vector<16x40xf32>
    %c0_3 = arith.constant 0 : index
    %c0_4 = arith.constant 0 : index
    %3 = vector.load %arg3[%c0_3, %c0_4] : memref<16x40xf32, #tpu.memory_space<vmem>>, vector<16x40xf32>
    tpu.vector_store %arg3[%c0_3, %c0_4], %2 {strides = array<i32>} : memref<16x40xf32, #tpu.memory_space<vmem>>, vector<16x40xf32>,
    return
  }
  func.func @transform_0(%arg0: i32) -> (i32, i32) {
    %c0_i32 = arith.constant 0 : i32
    %c0_i32_0 = arith.constant 0 : i32
    return %arg0, %c0_i32 : i32, i32
  }
  func.func @transform_1(%arg0: i32) -> (i32, i32) {
    %c0_i32 = arith.constant 0 : i32
    %c0_i32_0 = arith.constant 0 : i32
    %c0_i32_1 = arith.constant 0 : i32
    return %c0_i32, %c0_i32_0 : i32, i32
  }
  func.func @transform_2(%arg0: i32) -> (i32, i32) {
    %c0_i32 = arith.constant 0 : i32
    %c0_i32_0 = arith.constant 0 : i32
    return %arg0, %c0_i32 : i32, i32
  }
}

</mosaic_0001>

<bundles_post_ra>
// kernel: tpu_custom_call.1
= control target key start
LH: loop header
LB: loop body
LE: loop exit
PB: predicated region body
PF: predicated region fallthrough
CT: control target
= control target key end

     0   :  { %7 = vsyncpa [#allocation3], 0  ;;  %s325_s0 = inlined_call_operand.hbm [shape: f32[16,40], index: 0, kind: input, shape index: {}]   ;;  %s326_s1 = inlined_call_operand.hbm [shape: f32[40,40], index: 1, kind: input, shape index: {}]   ;;  %s327_s2 = inlined_call_operand.hbm [shape: f32[16,40], index: 2, kind: output, shape index: {}]  }
   0x1   :  { %8 = vsyncpa [#allocation6], 0 }
   0x2   :  { %9 = vsyncpa [#allocation4], 0  ;;  %s256_s9 = smov [#allocation2]   ;;  %s184_s13 = scalar_lea.hbm %s325_s0, 256 }
   0x3   :  { %s15_s10 = sshll.u32 %s256_s9, 4  ;;  %p185_p0 = scmp.ne.s32.totalorder %s325_s0, %s184_s13  ;;  %s16_s10 = int_to_ptr.vmem [resolvable:$true] %s15_s10 }
   0x4   :  { %p188_p1 = scmp.lt.u32.totalorder %s184_s13, %s325_s0 }
   0x6   :  { %p190_p2 = pnand %p188_p1, %p185_p0 }
   0x8   :  { %193 = shalt.err (!%p190_p2)
}
   0x9   :  { %s194_s18 = scalar_lea.vmem %s16_s10, 256  ;;  %p199_p4 = scmp.lt.s32.totalorder %s16_s10, %s16_s10 }
   0xa   :  { %p195_p3 = scmp.ne.s32.totalorder %s16_s10, %s194_s18  ;;  %p200_p5 = scmp.lt.s32.totalorder %s194_s18, %s194_s18 }
   0xc   :  { %p201_p6 = por %p200_p5, %p199_p4 }
   0xe   :  { %p202_p7 = pnand %p201_p6, %p195_p3 }
  0x10   :  { %205 = shalt.err (!%p202_p7)
}
  0x11   :  { %s257_s19 = smov 128   ;;  %s258_s20 = smov 8  }
  0x12   :  { %21 = dma.hbm_to_vmem [thread:$0]  %s325_s0, 256, %s16_s10, [#allocation3], %s257_s19, %s257_s19, %s258_s20  }
  0x13   :  { %s259_s23 = smov [#allocation5]   ;;  %s206_s27 = scalar_lea.hbm %s326_s1, 640 }
  0x14   :  { %s27_s24 = sshll.u32 %s259_s23, 4  ;;  %p207_p8 = scmp.ne.s32.totalorder %s326_s1, %s206_s27  ;;  %s28_s24 = int_to_ptr.vmem [resolvable:$true] %s27_s24 }
  0x15   :  { %p210_p9 = scmp.lt.u32.totalorder %s206_s27, %s326_s1 }
  0x17   :  { %p212_p10 = pnand %p210_p9, %p207_p8 }
  0x19   :  { %215 = shalt.err (!%p212_p10)
}
  0x1a   :  { %s216_s4 = scalar_lea.vmem %s28_s24, 640  ;;  %p221_p12 = scmp.lt.s32.totalorder %s28_s24, %s28_s24 }
  0x1b   :  { %p217_p11 = scmp.ne.s32.totalorder %s28_s24, %s216_s4  ;;  %p222_p13 = scmp.lt.s32.totalorder %s216_s4, %s216_s4 }
  0x1d   :  { %p223_p0 = por %p222_p13, %p221_p12 }
  0x1f   :  { %p224_p1 = pnand %p223_p0, %p217_p11 }
  0x21   :  { %227 = shalt.err (!%p224_p1)
}
  0x22   :  { %33 = dma.hbm_to_vmem [thread:$0]  %s326_s1, 640, %s28_s24, [#allocation6], %s257_s19, %s257_s19, %s258_s20  }
  0x23   :  { %250 = dma.done.wait [#allocation3], 256  }
  0x24   :  { %251 = vsyncadd [#allocation3], 4294967040 }
  0x25   :  { %252 = dma.done.wait [#allocation6], 640  }
  0x26   :  { %253 = vsyncadd [#allocation6], 4294966656  ;;  %vm47_vm0 = vcmask 326656   ;;  %v42_v0 = vld [vmem:[#allocation5] sm:$0xff]  ;;  %v43_v1 = vld [vmem:[#allocation5 + $0x8] sm:$0xff]  ;;  %s260_s1 = smov [#allocation7]  }
  0x27   :  { %v44_v2 = vld [vmem:[#allocation5 + $0x10] sm:$0xff]  ;;  %v171_v3 = vpack.c.bf16 %v43_v1, %v42_v0  ;;  %v45_v4 = vld [vmem:[#allocation5 + $0x18] sm:$0xff]  ;;  %v46_v7 = vld [vmem:[#allocation5 + $0x20] sm:$0xff]  ;;  %s136_s6 = sshll.u32 %s260_s1, 4  ;;  %s137_s6 = int_to_ptr.vmem [resolvable:$true] %s136_s6 }
  0x28   :  { %v40_v5 = vld [vmem:[#allocation2] sm:$0xff]  ;;  %v175_v6 = vpack.c.bf16 %v45_v4, %v44_v2  ;;  %v41_v8 = vld [vmem:[#allocation2 + $0x8] sm:$0xff]  ;;  %s228_s7 = scalar_lea.vmem %s137_s6, 256  ;;  %p233_p3 = scmp.lt.s32.totalorder %s137_s6, %s137_s6 }
  0x29   :  { %168 = vmatprep.mubr.msk.f32.mxu0 %vm47_vm0, %v40_v5  ;;  %172 = vmatprep.subr.bf16.mxu0 %v171_v3  ;;  %p229_p2 = scmp.ne.s32.totalorder %s137_s6, %s228_s7  ;;  %p234_p4 = scmp.lt.s32.totalorder %s228_s7, %s228_s7 }
  0x2a   :  { %174 = vmatpush3.bf16.msra.mxu0 %v171_v3 }
  0x2b   :  { %176 = vmatprep.subr.bf16.mxu0 %v175_v6  ;;  %p235_p5 = por %p234_p4, %p233_p3 }
  0x2d   :  { %p236_p6 = pnand %p235_p5, %p229_p2 }
  0x2e   :  { %178 = vmatpush3.bf16.msra.mxu0 %v175_v6 }
  0x2f   :  { %166 = vmatprep.subr.mxu0 %v46_v7 }
  0x32   :  { %167 = vmatpush3.msra.mxu0 %v46_v7 }
  0x33   :  { %169 = vmatmul.mubr.msk.f32.vlgmr.msra.gmra.mrb[0].mxu0 %vm47_vm0, %v41_v8 }
 0x106   :  { %v170_v9 = vpop.f32.mrb[0].mxu0 }
 0x107   :  { %130 = vst.msk [vmem:[#allocation7 + $0x8] sm:$0xff] %vm47_vm0, %v170_v9  ;;  %v120_v10 = vpop.f32.mrb[1].mxu0 }
 0x108   :  { %129 = vst.msk [vmem:[#allocation7] sm:$0xff] %vm47_vm0, %v120_v10 }
 0x109   :  { %239 = shalt.err (!%p236_p6)
}
 0x10a   :  { %s240_s10 = scalar_lea.hbm %s327_s2, 256 }
 0x10b   :  { %p241_p7 = scmp.ne.s32.totalorder %s327_s2, %s240_s10  ;;  %p244_p8 = scmp.lt.u32.totalorder %s240_s10, %s327_s2 }
 0x10d   :  { %p246_p9 = pnand %p244_p8, %p241_p7 }
 0x10f   :  { %249 = shalt.err (!%p246_p9)
}
 0x110   :  { %142 = dma.vmem_to_hbm [thread:$0]  %s137_s6, 256, %s327_s2, [#allocation4], %s257_s19, %s257_s19, %s258_s20  }
 0x111   :  { %254 = dma.done.wait [#allocation4], 256  }
 0x112   :  { %255 = vsyncadd [#allocation4], 4294967040 }
 0x113   :  { %146 = vsyncpa [#allocation3], 1 }
 0x114   :  { %147 = vsyncpa [#allocation6], 1 }
 0x115   :  { %148 = vsyncpa [#allocation4], 1 }

</bundles_post_ra>
